<compile_context>
chip_gen: v5e
topology: v5e:2x2
jax: 0.10.0
libtpu: 0.0.40
codegen_flags: <defaults>
</compile_context>

<pallas_src>
import jax
import jax.numpy as jnp
from jax.experimental import pallas as pl
from jax.experimental.pallas import tpu as pltpu


def _cdiv(a, b):
    return (a + b - 1) // b


def _round_up(a, b):
    return _cdiv(a, b) * b


def mlp_kernel(x_ref, w1_ref, b1_ref, w2_ref, b2_ref, w3_ref, b3_ref, o_ref):
    xT = x_ref[...]                       # (8, T): features on sublanes, batch on lanes

    def sigmoid(z):
        # logistic(z) == 0.5*tanh(0.5*z)+0.5; tanh runs on the EUP slot, keeping
        # the (binding) VALU slot free of a divide.
        return 0.5 * jnp.tanh(0.5 * z) + 0.5

    # ---- layer 1: 8 -> 6. Unrolled VPU broadcast-MACs (K=8 -> MXU tiles would
    # be >95% padding). Accumulator starts from the first MAC term; the bias is
    # added once at the end instead of a materialized (out, T) broadcast.
    w1 = w1_ref[...]                      # (6, 8)
    acc = w1[:, 0:1] * xT[0:1, :]
    for k in range(1, 8):
        acc = acc + w1[:, k:k + 1] * xT[k:k + 1, :]
    h1 = sigmoid(acc + b1_ref[...])       # (6, T)

    # ---- layer 2: 6 -> 4
    w2 = w2_ref[...]                      # (4, 6)
    acc = w2[:, 0:1] * h1[0:1, :]
    for k in range(1, 6):
        acc = acc + w2[:, k:k + 1] * h1[k:k + 1, :]
    h2 = sigmoid(acc + b2_ref[...])       # (4, T)

    # ---- layer 3: 4 -> 1 as elementwise multiply + sublane reduction: the adds
    # go to the XLU and no per-row sublane extracts are needed (out_dim == 1).
    y = jnp.sum(w3_ref[...] * h2, axis=0, keepdims=True) + b3_ref[...]   # (1, T)
    o_ref[...] = sigmoid(y)               # (1, T) lane-dense store


def mlp_forward(x, params, tile_n=16384):
    """x: (N, 8) float32. Returns (N, 1) float32, matching the PyTorch module."""
    w1, b1, w2, b2, w3, b3 = params  # (8,6),(1,6),(6,4),(1,4),(4,1),(1,1)
    assert x.ndim == 2 and x.shape[1] == 8
    assert w1.shape == (8, 6) and w2.shape == (6, 4) and w3.shape == (4, 1)
    # Lane (last) block dim must stay a multiple of 128; 512-granular keeps DMA
    # bursts long, and <= 64K keeps double-buffered tiles comfortably in VMEM
    # on every generation (incl. v7x's 64 MiB).
    assert tile_n % 512 == 0 and 512 <= tile_n <= 65536

    n = x.shape[0]
    # Balance the batch over the fewest tiles of size <= tile_n (multiple of
    # 512): small batches don't pay for a mostly-padded mega-tile, large
    # batches get many grid steps for v7x 2-TC sharding of the parallel axis.
    n_units = _round_up(max(n, 1), 512) // 512
    num_tiles = _cdiv(n_units * 512, tile_n)
    tile = _cdiv(n_units, num_tiles) * 512
    n_pad = num_tiles * tile

    # Feature-major (8, n_pad): every load, VPU/EUP op and the store are
    # lane-dense.  Ideally the upstream producer would emit feature-major data
    # so this one extra XLA pad+transpose pass over x disappears.
    xT = jnp.pad(x.astype(jnp.float32), ((0, n_pad - n), (0, 0))).T   # (8, n_pad)

    # Weights pre-transposed to (out, in) so w[:, k:k+1] is a static lane slice
    # inside the kernel; biases as (out, 1) columns; final layer kept (4, 1)
    # for the sublane-reduction contraction.
    w1T = w1.T.astype(jnp.float32)                 # (6, 8)
    w2T = w2.T.astype(jnp.float32)                 # (4, 6)
    w3c = w3.astype(jnp.float32).reshape(4, 1)     # (4, 1)
    b1c = b1.reshape(-1, 1).astype(jnp.float32)    # (6, 1)
    b2c = b2.reshape(-1, 1).astype(jnp.float32)    # (4, 1)
    b3c = b3.reshape(-1, 1).astype(jnp.float32)    # (1, 1)

    resident = lambda a: pl.BlockSpec(a.shape, lambda i: (0, 0))   # VMEM-resident

    out = pl.pallas_call(
        mlp_kernel,
        out_shape=jax.ShapeDtypeStruct((num_tiles, tile), jnp.float32),
        grid=(num_tiles,),
        in_specs=[
            pl.BlockSpec((8, tile), lambda i: (0, i)),   # streamed x tile
            resident(w1T), resident(b1c),
            resident(w2T), resident(b2c),
            resident(w3c), resident(b3c),
        ],
        # One dense lane-major row of the (num_tiles, tile) slab per grid step:
        # avoids the 8x sublane-padded (1, n_pad) output and the final .T pass.
        out_specs=pl.BlockSpec((1, tile), lambda i: (i, 0)),
        compiler_params=pltpu.CompilerParams(
            dimension_semantics=("parallel",),
            # Covers 2x(8, tile) input buffers + output buffers + intermediates;
            # above v5e's 16 MiB scoped default, under v7x's 64 MiB physical.
            vmem_limit_bytes=32 * 1024 * 1024,
        ),
    )(xT, w1T, b1c, w2T, b2c, w3c, b3c)

    # Row-major flatten keeps batch order (tiles are contiguous column ranges).
    return out.reshape(-1)[:n].reshape(n, 1)


def init_params(key):
    # Deterministic init matching the module's layer sizes, stored (in, out).
    k1, k2, k3, k4, k5, k6 = jax.random.split(key, 6)
    w1 = jax.random.normal(k1, (8, 6), jnp.float32) * 0.1
    b1 = jax.random.normal(k2, (1, 6), jnp.float32) * 0.1
    w2 = jax.random.normal(k3, (6, 4), jnp.float32) * 0.1
    b2 = jax.random.normal(k4, (1, 4), jnp.float32) * 0.1
    w3 = jax.random.normal(k5, (4, 1), jnp.float32) * 0.1
    b3 = jax.random.normal(k6, (1, 1), jnp.float32) * 0.1
    return (w1, b1, w2, b2, w3, b3)


def reference_forward(x, params):
    w1, b1, w2, b2, w3, b3 = params
    h1 = jax.nn.sigmoid(x @ w1 + b1)
    h2 = jax.nn.sigmoid(h1 @ w2 + b2)
    return jax.nn.sigmoid(h2 @ w3 + b3)


if __name__ == "__main__":
    key = jax.random.PRNGKey(0)
    kx, kp = jax.random.split(key)
    params = init_params(kp)

    # Small check consistent with the module: batch of 8 feature-vectors of size 8.
    batch = 8
    x = jax.random.normal(kx, (batch, 8), jnp.float32)
    out = jax.block_until_ready(mlp_forward(x, params))
    ref = reference_forward(x, params)
    assert out.shape == (batch, 1)
    assert jnp.allclose(out, ref, atol=1e-5, rtol=1e-5)

    # Multi-tile + padding path (exercises the batch grid / index maps).
    batch2 = 1300
    x2 = jax.random.normal(jax.random.PRNGKey(1), (batch2, 8), jnp.float32)
    out2 = jax.block_until_ready(mlp_forward(x2, params, tile_n=512))
    ref2 = reference_forward(x2, params)
    assert out2.shape == (batch2, 1)
    assert jnp.allclose(out2, ref2, atol=1e-5, rtol=1e-5)

    print("KERNEL_OK")
</pallas_src>

<mosaic_0001>
module attributes {stable_mosaic.version = 11 : i64} {
  func.func @mlp_kernel(%arg0: i32, %arg1: memref<8x512xf32, #tpu.memory_space<vmem>>, %arg2: memref<6x8xf32, #tpu.memory_space<vmem>>, %arg3: memref<6x1xf32, #tpu.memory_space<vmem>>, %arg4: memref<4x6xf32, #tpu.memory_space<vmem>>, %arg5: memref<4x1xf32, #tpu.memory_space<vmem>>, %arg6: memref<4x1xf32, #tpu.memory_space<vmem>>, %arg7: memref<1x1xf32, #tpu.memory_space<vmem>>, %arg8: memref<1x512xf32, #tpu.memory_space<vmem>>) attributes {dimension_semantics = [#tpu.dimension_semantics<parallel>], iteration_bounds = array<i64: 1>, scalar_prefetch = 0 : i64, scratch_operands = 0 : i64, tpu.core_type = #tpu.core_type<tc>, window_params = [{transform_indices = @transform_0, window_bounds = array<i64: 8, 512>}, {pipeline_mode = #tpu.pipeline_mode<synchronous>, transform_indices = @transform_1, window_bounds = array<i64: 6, 8>}, {pipeline_mode = #tpu.pipeline_mode<synchronous>, transform_indices = @transform_2, window_bounds = array<i64: 6, 1>}, {pipeline_mode = #tpu.pipeline_mode<synchronous>, transform_indices = @transform_3, window_bounds = array<i64: 4, 6>}, {pipeline_mode = #tpu.pipeline_mode<synchronous>, transform_indices = @transform_4, window_bounds = array<i64: 4, 1>}, {pipeline_mode = #tpu.pipeline_mode<synchronous>, transform_indices = @transform_5, window_bounds = array<i64: 4, 1>}, {pipeline_mode = #tpu.pipeline_mode<synchronous>, transform_indices = @transform_6, window_bounds = array<i64: 1, 1>}, {transform_indices = @transform_7, window_bounds = array<i64: 1, 512>}]} {
    %c0 = arith.constant 0 : index
    %c0_0 = arith.constant 0 : index
    %0 = vector.load %arg1[%c0, %c0_0] : memref<8x512xf32, #tpu.memory_space<vmem>>, vector<8x512xf32>
    %c0_1 = arith.constant 0 : index
    %c0_2 = arith.constant 0 : index
    %1 = vector.load %arg2[%c0_1, %c0_2] : memref<6x8xf32, #tpu.memory_space<vmem>>, vector<6x8xf32>
    %2 = vector.extract_strided_slice %1 {offsets = [0, 0], sizes = [6, 1], strides = [1, 1]} : vector<6x8xf32> to vector<6x1xf32>
    %3 = vector.extract_strided_slice %0 {offsets = [0, 0], sizes = [1, 512], strides = [1, 1]} : vector<8x512xf32> to vector<1x512xf32>
    %4 = vector.broadcast %2 : vector<6x1xf32> to vector<6x512xf32>
    %5 = vector.broadcast %3 : vector<1x512xf32> to vector<6x512xf32>
    %6 = arith.mulf %4, %5 : vector<6x512xf32>
    %7 = vector.extract_strided_slice %1 {offsets = [0, 1], sizes = [6, 1], strides = [1, 1]} : vector<6x8xf32> to vector<6x1xf32>
    %8 = vector.extract_strided_slice %0 {offsets = [1, 0], sizes = [1, 512], strides = [1, 1]} : vector<8x512xf32> to vector<1x512xf32>
    %9 = vector.broadcast %7 : vector<6x1xf32> to vector<6x512xf32>
    %10 = vector.broadcast %8 : vector<1x512xf32> to vector<6x512xf32>
    %11 = arith.mulf %9, %10 : vector<6x512xf32>
    %12 = arith.addf %6, %11 : vector<6x512xf32>
    %13 = vector.extract_strided_slice %1 {offsets = [0, 2], sizes = [6, 1], strides = [1, 1]} : vector<6x8xf32> to vector<6x1xf32>
    %14 = vector.extract_strided_slice %0 {offsets = [2, 0], sizes = [1, 512], strides = [1, 1]} : vector<8x512xf32> to vector<1x512xf32>
    %15 = vector.broadcast %13 : vector<6x1xf32> to vector<6x512xf32>
    %16 = vector.broadcast %14 : vector<1x512xf32> to vector<6x512xf32>
    %17 = arith.mulf %15, %16 : vector<6x512xf32>
    %18 = arith.addf %12, %17 : vector<6x512xf32>
    %19 = vector.extract_strided_slice %1 {offsets = [0, 3], sizes = [6, 1], strides = [1, 1]} : vector<6x8xf32> to vector<6x1xf32>
    %20 = vector.extract_strided_slice %0 {offsets = [3, 0], sizes = [1, 512], strides = [1, 1]} : vector<8x512xf32> to vector<1x512xf32>
    %21 = vector.broadcast %19 : vector<6x1xf32> to vector<6x512xf32>
    %22 = vector.broadcast %20 : vector<1x512xf32> to vector<6x512xf32>
    %23 = arith.mulf %21, %22 : vector<6x512xf32>
    %24 = arith.addf %18, %23 : vector<6x512xf32>
    %25 = vector.extract_strided_slice %1 {offsets = [0, 4], sizes = [6, 1], strides = [1, 1]} : vector<6x8xf32> to vector<6x1xf32>
    %26 = vector.extract_strided_slice %0 {offsets = [4, 0], sizes = [1, 512], strides = [1, 1]} : vector<8x512xf32> to vector<1x512xf32>
    %27 = vector.broadcast %25 : vector<6x1xf32> to vector<6x512xf32>
    %28 = vector.broadcast %26 : vector<1x512xf32> to vector<6x512xf32>
    %29 = arith.mulf %27, %28 : vector<6x512xf32>
    %30 = arith.addf %24, %29 : vector<6x512xf32>
    %31 = vector.extract_strided_slice %1 {offsets = [0, 5], sizes = [6, 1], strides = [1, 1]} : vector<6x8xf32> to vector<6x1xf32>
    %32 = vector.extract_strided_slice %0 {offsets = [5, 0], sizes = [1, 512], strides = [1, 1]} : vector<8x512xf32> to vector<1x512xf32>
    %33 = vector.broadcast %31 : vector<6x1xf32> to vector<6x512xf32>
    %34 = vector.broadcast %32 : vector<1x512xf32> to vector<6x512xf32>
    %35 = arith.mulf %33, %34 : vector<6x512xf32>
    %36 = arith.addf %30, %35 : vector<6x512xf32>
    %37 = vector.extract_strided_slice %1 {offsets = [0, 6], sizes = [6, 1], strides = [1, 1]} : vector<6x8xf32> to vector<6x1xf32>
    %38 = vector.extract_strided_slice %0 {offsets = [6, 0], sizes = [1, 512], strides = [1, 1]} : vector<8x512xf32> to vector<1x512xf32>
    %39 = vector.broadcast %37 : vector<6x1xf32> to vector<6x512xf32>
    %40 = vector.broadcast %38 : vector<1x512xf32> to vector<6x512xf32>
    %41 = arith.mulf %39, %40 : vector<6x512xf32>
    %42 = arith.addf %36, %41 : vector<6x512xf32>
    %43 = vector.extract_strided_slice %1 {offsets = [0, 7], sizes = [6, 1], strides = [1, 1]} : vector<6x8xf32> to vector<6x1xf32>
    %44 = vector.extract_strided_slice %0 {offsets = [7, 0], sizes = [1, 512], strides = [1, 1]} : vector<8x512xf32> to vector<1x512xf32>
    %45 = vector.broadcast %43 : vector<6x1xf32> to vector<6x512xf32>
    %46 = vector.broadcast %44 : vector<1x512xf32> to vector<6x512xf32>
    %47 = arith.mulf %45, %46 : vector<6x512xf32>
    %48 = arith.addf %42, %47 : vector<6x512xf32>
    %c0_3 = arith.constant 0 : index
    %c0_4 = arith.constant 0 : index
    %49 = vector.load %arg3[%c0_3, %c0_4] : memref<6x1xf32, #tpu.memory_space<vmem>>, vector<6x1xf32>
    %50 = vector.broadcast %49 : vector<6x1xf32> to vector<6x512xf32>
    %51 = arith.addf %48, %50 : vector<6x512xf32>
    %cst = arith.constant 5.000000e-01 : f32
    %52 = vector.broadcast %cst : f32 to vector<6x512xf32>
    %53 = arith.mulf %52, %51 : vector<6x512xf32>
    %54 = math.tanh %53 : vector<6x512xf32>
    %cst_5 = arith.constant 5.000000e-01 : f32
    %55 = vector.broadcast %cst_5 : f32 to vector<6x512xf32>
    %56 = arith.mulf %55, %54 : vector<6x512xf32>
    %cst_6 = arith.constant 5.000000e-01 : f32
    %57 = vector.broadcast %cst_6 : f32 to vector<6x512xf32>
    %58 = arith.addf %56, %57 : vector<6x512xf32>
    %c0_7 = arith.constant 0 : index
    %c0_8 = arith.constant 0 : index
    %59 = vector.load %arg4[%c0_7, %c0_8] : memref<4x6xf32, #tpu.memory_space<vmem>>, vector<4x6xf32>
    %60 = vector.extract_strided_slice %59 {offsets = [0, 0], sizes = [4, 1], strides = [1, 1]} : vector<4x6xf32> to vector<4x1xf32>
    %61 = vector.extract_strided_slice %58 {offsets = [0, 0], sizes = [1, 512], strides = [1, 1]} : vector<6x512xf32> to vector<1x512xf32>
    %62 = vector.broadcast %60 : vector<4x1xf32> to vector<4x512xf32>
    %63 = vector.broadcast %61 : vector<1x512xf32> to vector<4x512xf32>
    %64 = arith.mulf %62, %63 : vector<4x512xf32>
    %65 = vector.extract_strided_slice %59 {offsets = [0, 1], sizes = [4, 1], strides = [1, 1]} : vector<4x6xf32> to vector<4x1xf32>
    %66 = vector.extract_strided_slice %58 {offsets = [1, 0], sizes = [1, 512], strides = [1, 1]} : vector<6x512xf32> to vector<1x512xf32>
    %67 = vector.broadcast %65 : vector<4x1xf32> to vector<4x512xf32>
    %68 = vector.broadcast %66 : vector<1x512xf32> to vector<4x512xf32>
    %69 = arith.mulf %67, %68 : vector<4x512xf32>
    %70 = arith.addf %64, %69 : vector<4x512xf32>
    %71 = vector.extract_strided_slice %59 {offsets = [0, 2], sizes = [4, 1], strides = [1, 1]} : vector<4x6xf32> to vector<4x1xf32>
    %72 = vector.extract_strided_slice %58 {offsets = [2, 0], sizes = [1, 512], strides = [1, 1]} : vector<6x512xf32> to vector<1x512xf32>
    %73 = vector.broadcast %71 : vector<4x1xf32> to vector<4x512xf32>
    %74 = vector.broadcast %72 : vector<1x512xf32> to vector<4x512xf32>
    %75 = arith.mulf %73, %74 : vector<4x512xf32>
    %76 = arith.addf %70, %75 : vector<4x512xf32>
    %77 = vector.extract_strided_slice %59 {offsets = [0, 3], sizes = [4, 1], strides = [1, 1]} : vector<4x6xf32> to vector<4x1xf32>
    %78 = vector.extract_strided_slice %58 {offsets = [3, 0], sizes = [1, 512], strides = [1, 1]} : vector<6x512xf32> to vector<1x512xf32>
    %79 = vector.broadcast %77 : vector<4x1xf32> to vector<4x512xf32>
    %80 = vector.broadcast %78 : vector<1x512xf32> to vector<4x512xf32>
    %81 = arith.mulf %79, %80 : vector<4x512xf32>
    %82 = arith.addf %76, %81 : vector<4x512xf32>
    %83 = vector.extract_strided_slice %59 {offsets = [0, 4], sizes = [4, 1], strides = [1, 1]} : vector<4x6xf32> to vector<4x1xf32>
    %84 = vector.extract_strided_slice %58 {offsets = [4, 0], sizes = [1, 512], strides = [1, 1]} : vector<6x512xf32> to vector<1x512xf32>
    %85 = vector.broadcast %83 : vector<4x1xf32> to vector<4x512xf32>
    %86 = vector.broadcast %84 : vector<1x512xf32> to vector<4x512xf32>
    %87 = arith.mulf %85, %86 : vector<4x512xf32>
    %88 = arith.addf %82, %87 : vector<4x512xf32>
    %89 = vector.extract_strided_slice %59 {offsets = [0, 5], sizes = [4, 1], strides = [1, 1]} : vector<4x6xf32> to vector<4x1xf32>
    %90 = vector.extract_strided_slice %58 {offsets = [5, 0], sizes = [1, 512], strides = [1, 1]} : vector<6x512xf32> to vector<1x512xf32>
    %91 = vector.broadcast %89 : vector<4x1xf32> to vector<4x512xf32>
    %92 = vector.broadcast %90 : vector<1x512xf32> to vector<4x512xf32>
    %93 = arith.mulf %91, %92 : vector<4x512xf32>
    %94 = arith.addf %88, %93 : vector<4x512xf32>
    %c0_9 = arith.constant 0 : index
    %c0_10 = arith.constant 0 : index
    %95 = vector.load %arg5[%c0_9, %c0_10] : memref<4x1xf32, #tpu.memory_space<vmem>>, vector<4x1xf32>
    %96 = vector.broadcast %95 : vector<4x1xf32> to vector<4x512xf32>
    %97 = arith.addf %94, %96 : vector<4x512xf32>
    %cst_11 = arith.constant 5.000000e-01 : f32
    %98 = vector.broadcast %cst_11 : f32 to vector<4x512xf32>
    %99 = arith.mulf %98, %97 : vector<4x512xf32>
    %100 = math.tanh %99 : vector<4x512xf32>
    %cst_12 = arith.constant 5.000000e-01 : f32
    %101 = vector.broadcast %cst_12 : f32 to vector<4x512xf32>
    %102 = arith.mulf %101, %100 : vector<4x512xf32>
    %cst_13 = arith.constant 5.000000e-01 : f32
    %103 = vector.broadcast %cst_13 : f32 to vector<4x512xf32>
    %104 = arith.addf %102, %103 : vector<4x512xf32>
    %c0_14 = arith.constant 0 : index
    %c0_15 = arith.constant 0 : index
    %105 = vector.load %arg6[%c0_14, %c0_15] : memref<4x1xf32, #tpu.memory_space<vmem>>, vector<4x1xf32>
    %106 = vector.broadcast %105 : vector<4x1xf32> to vector<4x512xf32>
    %107 = arith.mulf %106, %104 : vector<4x512xf32>
    %cst_16 = arith.constant dense<0.000000e+00> : vector<512xf32>
    %108 = vector.multi_reduction <add>, %107, %cst_16 [0] : vector<4x512xf32> to vector<512xf32>
    %109 = vector.shape_cast %108 : vector<512xf32> to vector<1x512xf32>
    %c0_17 = arith.constant 0 : index
    %c0_18 = arith.constant 0 : index
    %110 = vector.load %arg7[%c0_17, %c0_18] : memref<1x1xf32, #tpu.memory_space<vmem>>, vector<1x1xf32>
    %111 = vector.broadcast %110 : vector<1x1xf32> to vector<1x512xf32>
    %112 = arith.addf %109, %111 : vector<1x512xf32>
    %cst_19 = arith.constant 5.000000e-01 : f32
    %113 = vector.broadcast %cst_19 : f32 to vector<1x512xf32>
    %114 = arith.mulf %113, %112 : vector<1x512xf32>
    %115 = math.tanh %114 : vector<1x512xf32>
    %cst_20 = arith.constant 5.000000e-01 : f32
    %116 = vector.broadcast %cst_20 : f32 to vector<1x512xf32>
    %117 = arith.mulf %116, %115 : vector<1x512xf32>
    %cst_21 = arith.constant 5.000000e-01 : f32
    %118 = vector.broadcast %cst_21 : f32 to vector<1x512xf32>
    %119 = arith.addf %117, %118 : vector<1x512xf32>
    %c0_22 = arith.constant 0 : index
    %c0_23 = arith.constant 0 : index
    %120 = vector.load %arg8[%c0_22, %c0_23] : memref<1x512xf32, #tpu.memory_space<vmem>>, vector<1x512xf32>
    tpu.vector_store %arg8[%c0_22, %c0_23], %119 {strides = array<i32>} : memref<1x512xf32, #tpu.memory_space<vmem>>, vector<1x512xf32>,
    return
  }
  func.func @transform_0(%arg0: i32) -> (i32, i32) {
    %c0_i32 = arith.constant 0 : i32
    %c0_i32_0 = arith.constant 0 : i32
    return %c0_i32, %arg0 : i32, i32
  }
  func.func @transform_1(%arg0: i32) -> (i32, i32) {
    %c0_i32 = arith.constant 0 : i32
    %c0_i32_0 = arith.constant 0 : i32
    %c0_i32_1 = arith.constant 0 : i32
    return %c0_i32, %c0_i32_0 : i32, i32
  }
  func.func @transform_2(%arg0: i32) -> (i32, i32) {
    %c0_i32 = arith.constant 0 : i32
    %c0_i32_0 = arith.constant 0 : i32
    %c0_i32_1 = arith.constant 0 : i32
    return %c0_i32, %c0_i32_0 : i32, i32
  }
  func.func @transform_3(%arg0: i32) -> (i32, i32) {
    %c0_i32 = arith.constant 0 : i32
    %c0_i32_0 = arith.constant 0 : i32
    %c0_i32_1 = arith.constant 0 : i32
    return %c0_i32, %c0_i32_0 : i32, i32
  }
  func.func @transform_4(%arg0: i32) -> (i32, i32) {
    %c0_i32 = arith.constant 0 : i32
    %c0_i32_0 = arith.constant 0 : i32
    %c0_i32_1 = arith.constant 0 : i32
    return %c0_i32, %c0_i32_0 : i32, i32
  }
  func.func @transform_5(%arg0: i32) -> (i32, i32) {
    %c0_i32 = arith.constant 0 : i32
    %c0_i32_0 = arith.constant 0 : i32
    %c0_i32_1 = arith.constant 0 : i32
    return %c0_i32, %c0_i32_0 : i32, i32
  }
  func.func @transform_6(%arg0: i32) -> (i32, i32) {
    %c0_i32 = arith.constant 0 : i32
    %c0_i32_0 = arith.constant 0 : i32
    %c0_i32_1 = arith.constant 0 : i32
    return %c0_i32, %c0_i32_0 : i32, i32
  }
  func.func @transform_7(%arg0: i32) -> (i32, i32) {
    %c0_i32 = arith.constant 0 : i32
    %c0_i32_0 = arith.constant 0 : i32
    return %arg0, %c0_i32 : i32, i32
  }
}

</mosaic_0001>

<bundles_post_ra>
// kernel: tpu_custom_call.1
= control target key start
LH: loop header
LB: loop body
LE: loop exit
PB: predicated region body
PF: predicated region fallthrough
CT: control target
= control target key end

     0   :  { %s675_s0 = inlined_call_operand.hbm [shape: f32[8,512], index: 0, kind: input, shape index: {}]   ;;  %s676_s1 = inlined_call_operand.vmem [shape: f32[6,8], index: 1, kind: input, shape index: {}]   ;;  %s677_s2 = inlined_call_operand.vmem [shape: f32[6,1], index: 2, kind: input, shape index: {}]   ;;  %s678_s3 = inlined_call_operand.vmem [shape: f32[4,6], index: 3, kind: input, shape index: {}]   ;;  %s679_s4 = inlined_call_operand.vmem [shape: f32[4,1], index: 4, kind: input, shape index: {}]   ;;  %s680_s5 = inlined_call_operand.vmem [shape: f32[4,1], index: 5, kind: input, shape index: {}]   ;;  %s681_s6 = inlined_call_operand.<no memory space> [shape: f32[1,1], index: 6, kind: input, shape index: {}]   ;;  %s682_s7 = inlined_call_operand.hbm [shape: f32[1,512], index: 7, kind: output, shape index: {}]  }
   0x1   :  { %v12_v0 = vstv %s681_s6 }
   0x2   :  { %13 = vst [vmem:[#allocation2] sm:$0x1] %v12_v0 }
   0x3   :  { %14 = vsyncpa [#allocation4], 0 }
   0x4   :  { %15 = vsyncpa [#allocation5], 0  ;;  %s21_s28 = sshll.u32 %s675_s0, 4  ;;  %s525_s29 = smov [#allocation3]   ;;  %s22_s28 = int_to_ptr.hbm [resolvable:$true] %s21_s28 }
   0x5   :  { %s23_s30 = sshll.u32 %s525_s29, 4  ;;  %s24_s30 = int_to_ptr.vmem [resolvable:$true] %s23_s30 }
   0x6   :  { %26 = dma.hbm_to_vmem [thread:$0]  %s22_s28, 512, %s24_s30, [#allocation4]  }
   0x7   :  { %521 = dma.done.wait [#allocation4], 512  }
   0x8   :  { %522 = vsyncadd [#allocation4], 4294966784  ;;  %v526_v1 = vmov 2   ;;  %v527_v2 = vmov 0   ;;  %v528_v3 = vmov 4   ;;  %v529_v5 = vmov 3  }
   0x9   :  { %433 = vset.pattern.permute.xlu1 %v526_v1  ;;  %431 = vset.pattern.permute.xlu0 %v527_v2  ;;  %v47_v4 = vld [vmem:[%s676_s1] sm:$0x3f]  ;;  %v530_v6 = vmov 1   ;;  %v531_v7 = vmov 5   ;;  %v532_v9 = vmov 6   ;;  %v533_v10 = vmov 7  }
   0xa   :  { %435 = vset.pattern.permute.xlu2 %v528_v3  ;;  %78 = vperm.xlu1 %433, %v47_v4   ;;  %v173_v8 = vld [vmem:[%s677_s2] sm:$0x3f]  ;;  %v598_v17 = vld [vmem:[#allocation3 + $0x8] sm:$0xff]  ;;  %v600_v18 = vld [vmem:[#allocation3 + $0x10] sm:$0xff]  ;;  %vm329_vm0 = vcmask 1043456   ;;  %vm392_vm1 = vcmask 1040384  }
   0xb   :  { %50 = vperm.xlu0 %431, %v47_v4   ;;  %110 = vperm.xlu2 %435, %v47_v4   ;;  %v199_v11 = vld [vmem:[%s678_s3] sm:$0xf]  ;;  %v54_v22 = vperm.slane %v598_v17, 0  ;;  %v55_v23 = vperm.slane %v600_v18, 0  ;;  %v114_v27 = vperm.slane %v598_v17, 4  ;;  %v115_v28 = vperm.slane %v600_v18, 4 }
   0xc   :  { %v293_v12 = vld [vmem:[%s679_s4] sm:$0xf]  ;;  %v82_v31 = vperm.slane %v598_v17, 2  ;;  %v83_v32 = vperm.slane %v600_v18, 2  ;;  %v66_v35 = vperm.slane %v598_v17, 1  ;;  %v67_v36 = vperm.slane %v600_v18, 1 }
   0xd   :  { %v319_v13 = vld [vmem:[%s680_s5] sm:$0xf]  ;;  %v98_v39 = vperm.slane %v598_v17, 3  ;;  %v99_v40 = vperm.slane %v600_v18, 3  ;;  %v130_v48 = vperm.slane %v598_v17, 5  ;;  %v131_v49 = vperm.slane %v600_v18, 5 }
   0xe   :  { %v358_v14 = vld [vmem:[#allocation2] sm:$0x1]  ;;  %v596_v16 = vld [vmem:[#allocation3] sm:$0xff]  ;;  %v146_v52 = vperm.slane %v598_v17, 6  ;;  %v147_v53 = vperm.slane %v600_v18, 6  ;;  %v162_v56 = vperm.slane %v598_v17, 7 }
   0xf   :  { %v602_v19 = vld [vmem:[#allocation3 + $0x18] sm:$0xff]  ;;  %v53_v21 = vperm.slane %v596_v16, 0  ;;  %v113_v26 = vperm.slane %v596_v16, 4  ;;  %v81_v30 = vperm.slane %v596_v16, 2  ;;  %v65_v34 = vperm.slane %v596_v16, 1  ;;  %s534_s4 = smov [#allocation6]  }
  0x10   :  { %v56_v24 = vperm.slane %v602_v19, 0  ;;  %v116_v29 = vperm.slane %v602_v19, 4  ;;  %v84_v33 = vperm.slane %v602_v19, 2  ;;  %v68_v37 = vperm.slane %v602_v19, 1  ;;  %s409_s5 = sshll.u32 %s534_s4, 4  ;;  %s411_s15 = sshll.u32 %s682_s7, 4  ;;  %s410_s5 = int_to_ptr.vmem [resolvable:$true] %s409_s5  ;;  %s412_s15 = int_to_ptr.hbm [resolvable:$true] %s411_s15 }
  0x11   :  { %v97_v38 = vperm.slane %v596_v16, 3  ;;  %v100_v41 = vperm.slane %v602_v19, 3  ;;  %v129_v47 = vperm.slane %v596_v16, 5  ;;  %v132_v50 = vperm.slane %v602_v19, 5 }
  0x12   :  { %434 = vset.pattern.permute.xlu1 %v529_v5  ;;  %v145_v51 = vperm.slane %v596_v16, 6  ;;  %v148_v54 = vperm.slane %v602_v19, 6  ;;  %v161_v55 = vperm.slane %v596_v16, 7  ;;  %v163_v57 = vperm.slane %v600_v18, 7 }
  0x13   :  { %432 = vset.pattern.permute.xlu0 %v530_v6  ;;  %94 = vperm.xlu1 %434, %v47_v4   ;;  %v164_v58 = vperm.slane %v602_v19, 7  ;;  %vm394_vm2 = vcmask 1042434   ;;  %vm396_vm3 = vcmask 1041408  }
  0x14   :  { %62 = vperm.xlu0 %432, %v47_v4   ;;  %436 = vset.pattern.permute.xlu2 %v531_v7 }
  0x15   :  { %126 = vperm.xlu2 %436, %v47_v4  }
  0x1b   :  { %437 = vset.pattern.permute.xlu1 %v532_v9 }
  0x1c   :  { %439 = vset.pattern.permute.xlu0 %v527_v2  ;;  %142 = vperm.xlu1 %437, %v47_v4  }
  0x1d   :  { %176 = vperm.xlu0 %439, %v173_v8   ;;  %438 = vset.pattern.permute.xlu2 %v533_v10 }
  0x1e   :  { %158 = vperm.xlu2 %438, %v47_v4  }
  0x24   :  { %440 = vset.pattern.permute.xlu1 %v527_v2 }
  0x25   :  { %444 = vset.pattern.permute.xlu0 %v528_v3  ;;  %202 = vperm.xlu1 %440, %v199_v11  }
  0x26   :  { %262 = vperm.xlu0 %444, %v199_v11   ;;  %441 = vset.pattern.permute.xlu2 %v530_v6 }
  0x27   :  { %214 = vperm.xlu2 %441, %v199_v11  }
  0x2d   :  { %442 = vset.pattern.permute.xlu1 %v526_v1 }
  0x2e   :  { %448 = vset.pattern.permute.xlu0 %v527_v2  ;;  %230 = vperm.xlu1 %442, %v199_v11  }
  0x2f   :  { %443 = vset.pattern.permute.xlu2 %v529_v5 }
  0x30   :  { %246 = vperm.xlu2 %443, %v199_v11  }
  0x36   :  { %445 = vset.pattern.permute.xlu1 %v531_v7 }
  0x37   :  { %278 = vperm.xlu1 %445, %v199_v11  }
  0x38   :  { %446 = vset.pattern.permute.xlu2 %v527_v2 }
  0x39   :  { %296 = vperm.xlu2 %446, %v293_v12  }
  0x3f   :  { %447 = vset.pattern.permute.xlu1 %v527_v2 }
  0x40   :  { %322 = vperm.xlu1 %447, %v319_v13  }
  0x41   :  { %361 = vperm.xlu2 %446, %v358_v14  }
  0x65   :  { %v111_v15 = vpop.permute.xlu2 %110 }
  0x66   :  { %v117_v43 = vmul.f32 %v113_v26, %v111_v15  ;;  %v118_v44 = vmul.f32 %v114_v27, %v111_v15  ;;  %v119_v45 = vmul.f32 %v115_v28, %v111_v15  ;;  %v120_v46 = vmul.f32 %v116_v29, %v111_v15 }
  0x6f   :  { %v127_v42 = vpop.permute.xlu2 %126 }
  0x70   :  { %v136_v26 = vmul.f32 %v132_v50, %v127_v42 }
  0x7c   :  { %v79_v25 = vpop.permute.xlu1 %78 }
  0x7d   :  { %v51_v20 = vpop.permute.xlu0 %50  ;;  %v85_v5 = vmul.f32 %v81_v30, %v79_v25  ;;  %v86_v6 = vmul.f32 %v82_v31, %v79_v25  ;;  %v87_v7 = vmul.f32 %v83_v32, %v79_v25  ;;  %v88_v8 = vmul.f32 %v84_v33, %v79_v25 }
  0x7e   :  { %v57_v59 = vmul.f32 %v53_v21, %v51_v20  ;;  %v58_v60 = vmul.f32 %v54_v22, %v51_v20  ;;  %v59_v61 = vmul.f32 %v55_v23, %v51_v20  ;;  %v60_v62 = vmul.f32 %v56_v24, %v51_v20  ;;  %v159_v21 = vpop.permute.xlu2 %158 }
  0x7f   :  { %v133_v22 = vmul.f32 %v129_v47, %v127_v42  ;;  %v134_v23 = vmul.f32 %v130_v48, %v127_v42  ;;  %v135_v24 = vmul.f32 %v131_v49, %v127_v42  ;;  %v165_v30 = vmul.f32 %v161_v55, %v159_v21 }
  0x80   :  { %v166_v31 = vmul.f32 %v162_v56, %v159_v21  ;;  %v167_v32 = vmul.f32 %v163_v57, %v159_v21  ;;  %v168_v33 = vmul.f32 %v164_v58, %v159_v21 }
  0x85   :  { %v95_v0 = vpop.permute.xlu1 %94 }
  0x86   :  { %v63_v63 = vpop.permute.xlu0 %62  ;;  %v101_v13 = vmul.f32 %v97_v38, %v95_v0  ;;  %v102_v14 = vmul.f32 %v98_v39, %v95_v0  ;;  %v103_v15 = vmul.f32 %v99_v40, %v95_v0  ;;  %v104_v16 = vmul.f32 %v100_v41, %v95_v0 }
  0x87   :  { %v69_v1 = vmul.f32 %v65_v34, %v63_v63  ;;  %v70_v2 = vmul.f32 %v66_v35, %v63_v63  ;;  %v71_v3 = vmul.f32 %v67_v36, %v63_v63  ;;  %v72_v4 = vmul.f32 %v68_v37, %v63_v63 }
  0x89   :  { %v73_v9 = vadd.f32 %v69_v1, %v57_v59  ;;  %v74_v10 = vadd.f32 %v70_v2, %v58_v60  ;;  %v75_v11 = vadd.f32 %v71_v3, %v59_v61  ;;  %v76_v12 = vadd.f32 %v72_v4, %v60_v62 }
  0x8b   :  { %v89_v17 = vadd.f32 %v85_v5, %v73_v9  ;;  %v90_v18 = vadd.f32 %v86_v6, %v74_v10  ;;  %v91_v19 = vadd.f32 %v87_v7, %v75_v11  ;;  %v92_v20 = vadd.f32 %v88_v8, %v76_v12  ;;  %v215_v9 = vpop.permute.xlu2 %214 }
  0x8d   :  { %v105_v27 = vadd.f32 %v101_v13, %v89_v17  ;;  %v106_v28 = vadd.f32 %v102_v14, %v90_v18  ;;  %v107_v25 = vadd.f32 %v103_v15, %v91_v19  ;;  %v108_v29 = vadd.f32 %v104_v16, %v92_v20 }
  0x8e   :  { %v143_v38 = vpop.permute.xlu1 %142 }
  0x8f   :  { %v121_v34 = vadd.f32 %v117_v43, %v105_v27  ;;  %v122_v35 = vadd.f32 %v118_v44, %v106_v28  ;;  %v123_v36 = vadd.f32 %v119_v45, %v107_v25  ;;  %v124_v37 = vadd.f32 %v120_v46, %v108_v29  ;;  %v177_v56 = vpop.permute.xlu0 %176 }
  0x90   :  { %v149_v39 = vmul.f32 %v145_v51, %v143_v38  ;;  %v150_v40 = vmul.f32 %v146_v52, %v143_v38  ;;  %v151_v41 = vmul.f32 %v147_v53, %v143_v38  ;;  %v152_v47 = vmul.f32 %v148_v54, %v143_v38 }
  0x91   :  { %v137_v48 = vadd.f32 %v133_v22, %v121_v34  ;;  %v138_v49 = vadd.f32 %v134_v23, %v122_v35  ;;  %v139_v42 = vadd.f32 %v135_v24, %v123_v36  ;;  %v140_v50 = vadd.f32 %v136_v26, %v124_v37 }
  0x93   :  { %v153_v59 = vadd.f32 %v149_v39, %v137_v48  ;;  %v154_v60 = vadd.f32 %v150_v40, %v138_v49  ;;  %v155_v61 = vadd.f32 %v151_v41, %v139_v42  ;;  %v156_v55 = vadd.f32 %v152_v47, %v140_v50 }
  0x95   :  { %v169_v57 = vadd.f32 %v165_v30, %v153_v59  ;;  %v170_v58 = vadd.f32 %v166_v31, %v154_v60  ;;  %v171_v43 = vadd.f32 %v167_v32, %v155_v61  ;;  %v172_v44 = vadd.f32 %v168_v33, %v156_v55  ;;  %v247_v60 = vpop.permute.xlu2 %246 }
  0x97   :  { %v179_v45 = vadd.f32 %v177_v56, %v169_v57  ;;  %v180_v46 = vadd.f32 %v177_v56, %v170_v58  ;;  %v181_v62 = vadd.f32 %v177_v56, %v171_v43  ;;  %v182_v51 = vadd.f32 %v177_v56, %v172_v44  ;;  %v203_v0 = vpop.permute.xlu1 %202 }
  0x98   :  { %v263_v43 = vpop.permute.xlu0 %262 }
  0x99   :  { %v183_v52 = vmul.f32 0.5, %v179_v45  ;;  %v184_v53 = vmul.f32 0.5, %v180_v46  ;;  %v185_v54 = vmul.f32 0.5, %v181_v62  ;;  %v186_v63 = vmul.f32 0.5, %v182_v51 }
  0x9b   :  { %449 = vtanh.f32 %v183_v52 }
  0x9c   :  { %451 = vtanh.f32 %v184_v53 }
  0x9d   :  { %453 = vtanh.f32 %v185_v54 }
  0x9e   :  { %455 = vtanh.f32 %v186_v63 }
  0xa0   :  { %v231_v24 = vpop.permute.xlu1 %230 }
  0xa1   :  { %v450_v1 = vpop.eup %449 }
  0xa2   :  { %v452_v2 = vpop.eup %451  ;;  %v191_v3 = vmul.f32 0.5, %v450_v1 }
  0xa3   :  { %v454_v4 = vpop.eup %453  ;;  %v192_v5 = vmul.f32 0.5, %v452_v2 }
  0xa4   :  { %v456_v6 = vpop.eup %455  ;;  %v193_v7 = vmul.f32 0.5, %v454_v4  ;;  %v636_v8 = vadd.f32 0.5, %v191_v3 }
  0xa5   :  { %v194_v10 = vmul.f32 0.5, %v456_v6  ;;  %v638_v11 = vadd.f32 0.5, %v192_v5 }
  0xa6   :  { %v640_v12 = vadd.f32 0.5, %v193_v7  ;;  %v205_v13 = vperm.slane %v636_v8, 0  ;;  %v217_v14 = vperm.slane %v636_v8, 1  ;;  %v233_v15 = vperm.slane %v636_v8, 2 }
  0xa7   :  { %v645_v16 = vadd.f32 0.5, %v194_v10  ;;  %v206_v17 = vperm.slane %v638_v11, 0  ;;  %v218_v18 = vperm.slane %v638_v11, 1  ;;  %v234_v19 = vperm.slane %v638_v11, 2 }
  0xa8   :  { %v207_v20 = vperm.slane %v640_v12, 0  ;;  %v209_v21 = vmul.f32 %v205_v13, %v203_v0  ;;  %v219_v22 = vperm.slane %v640_v12, 1  ;;  %v221_v23 = vmul.f32 %v217_v14, %v215_v9 }
  0xa9   :  { %v208_v26 = vperm.slane %v645_v16, 0  ;;  %v210_v27 = vmul.f32 %v206_v17, %v203_v0  ;;  %v220_v28 = vperm.slane %v645_v16, 1  ;;  %v222_v25 = vmul.f32 %v218_v18, %v215_v9  ;;  %v279_v3 = vpop.permute.xlu1 %278 }
  0xaa   :  { %v211_v29 = vmul.f32 %v207_v20, %v203_v0  ;;  %v223_v30 = vmul.f32 %v219_v22, %v215_v9  ;;  %v225_v31 = vadd.f32 %v221_v23, %v209_v21  ;;  %v235_v32 = vperm.slane %v640_v12, 2 }
  0xab   :  { %v212_v33 = vmul.f32 %v208_v26, %v203_v0  ;;  %v224_v34 = vmul.f32 %v220_v28, %v215_v9  ;;  %v226_v35 = vadd.f32 %v222_v25, %v210_v27  ;;  %v236_v36 = vperm.slane %v645_v16, 2 }
  0xac   :  { %v227_v37 = vadd.f32 %v223_v30, %v211_v29  ;;  %v237_v38 = vmul.f32 %v233_v15, %v231_v24  ;;  %v238_v39 = vmul.f32 %v234_v19, %v231_v24  ;;  %v239_v40 = vmul.f32 %v235_v32, %v231_v24 }
  0xad   :  { %v228_v41 = vadd.f32 %v224_v34, %v212_v33  ;;  %v240_v47 = vmul.f32 %v236_v36, %v231_v24  ;;  %v249_v48 = vperm.slane %v636_v8, 3  ;;  %v250_v49 = vperm.slane %v638_v11, 3  ;;  %v297_v24 = vpop.permute.xlu2 %296 }
  0xae   :  { %v241_v42 = vadd.f32 %v237_v38, %v225_v31  ;;  %v242_v50 = vadd.f32 %v238_v39, %v226_v35  ;;  %v243_v59 = vadd.f32 %v239_v40, %v227_v37  ;;  %v251_v61 = vperm.slane %v640_v12, 3 }
  0xaf   :  { %v244_v55 = vadd.f32 %v240_v47, %v228_v41  ;;  %v252_v56 = vperm.slane %v645_v16, 3  ;;  %v253_v57 = vmul.f32 %v249_v48, %v247_v60  ;;  %v254_v58 = vmul.f32 %v250_v49, %v247_v60 }
  0xb0   :  { %v255_v44 = vmul.f32 %v251_v61, %v247_v60  ;;  %v265_v45 = vperm.slane %v636_v8, 4  ;;  %v266_v46 = vperm.slane %v638_v11, 4  ;;  %v267_v62 = vperm.slane %v640_v12, 4 }
  0xb1   :  { %v256_v51 = vmul.f32 %v252_v56, %v247_v60  ;;  %v257_v52 = vadd.f32 %v253_v57, %v241_v42  ;;  %v258_v53 = vadd.f32 %v254_v58, %v242_v50  ;;  %v268_v54 = vperm.slane %v645_v16, 4 }
  0xb2   :  { %v259_v63 = vadd.f32 %v255_v44, %v243_v59  ;;  %v269_v0 = vmul.f32 %v265_v45, %v263_v43  ;;  %v270_v1 = vmul.f32 %v266_v46, %v263_v43  ;;  %v271_v2 = vmul.f32 %v267_v62, %v263_v43  ;;  %v323_v35 = vpop.permute.xlu1 %322 }
  0xb3   :  { %v260_v4 = vadd.f32 %v256_v51, %v244_v55  ;;  %v272_v5 = vmul.f32 %v268_v54, %v263_v43  ;;  %v281_v6 = vperm.slane %v636_v8, 5  ;;  %v282_v7 = vperm.slane %v638_v11, 5 }
  0xb4   :  { %v273_v9 = vadd.f32 %v269_v0, %v257_v52  ;;  %v274_v10 = vadd.f32 %v270_v1, %v258_v53  ;;  %v275_v13 = vadd.f32 %v271_v2, %v259_v63  ;;  %v283_v14 = vperm.slane %v640_v12, 5 }
  0xb5   :  { %v276_v15 = vadd.f32 %v272_v5, %v260_v4  ;;  %v284_v17 = vperm.slane %v645_v16, 5  ;;  %v285_v18 = vmul.f32 %v281_v6, %v279_v3  ;;  %v286_v19 = vmul.f32 %v282_v7, %v279_v3  ;;  %v362_v0 = vpop.permute.xlu2 %361 }
  0xb6   :  { %v287_v20 = vmul.f32 %v283_v14, %v279_v3  ;;  %v364_v7 = vperm.slane %v362_v0, 0 }
  0xb7   :  { %v288_v21 = vmul.f32 %v284_v17, %v279_v3  ;;  %v289_v22 = vadd.f32 %v285_v18, %v273_v9  ;;  %v290_v23 = vadd.f32 %v286_v19, %v274_v10 }
  0xb8   :  { %v291_v26 = vadd.f32 %v287_v20, %v275_v13 }
  0xb9   :  { %v292_v27 = vadd.f32 %v288_v21, %v276_v15  ;;  %v299_v8 = vadd.f32 %v297_v24, %v289_v22  ;;  %v300_v28 = vadd.f32 %v297_v24, %v290_v23 }
  0xba   :  { %v301_v11 = vadd.f32 %v297_v24, %v291_v26 }
  0xbb   :  { %v302_v25 = vadd.f32 %v297_v24, %v292_v27  ;;  %v303_v29 = vmul.f32 0.5, %v299_v8  ;;  %v304_v30 = vmul.f32 0.5, %v300_v28 }
  0xbc   :  { %v305_v31 = vmul.f32 0.5, %v301_v11 }
  0xbd   :  { %v306_v12 = vmul.f32 0.5, %v302_v25  ;;  %457 = vtanh.f32 %v303_v29 }
  0xbe   :  { %459 = vtanh.f32 %v304_v30 }
  0xbf   :  { %461 = vtanh.f32 %v305_v31 }
  0xc0   :  { %463 = vtanh.f32 %v306_v12 }
  0xc3   :  { %v458_v16 = vpop.eup %457 }
  0xc4   :  { %v460_v32 = vpop.eup %459  ;;  %v311_v33 = vmul.f32 0.5, %v458_v16 }
  0xc5   :  { %v462_v34 = vpop.eup %461  ;;  %v312_v36 = vmul.f32 0.5, %v460_v32  ;;  %v399_v32 = vlaneseq }
  0xc6   :  { %v464_v37 = vpop.eup %463  ;;  %v313_v38 = vmul.f32 0.5, %v462_v34  ;;  %v315_v39 = vadd.f32 0.5, %v311_v33 }
  0xc7   :  { %v314_v40 = vmul.f32 0.5, %v464_v37  ;;  %v316_v41 = vadd.f32 0.5, %v312_v36  ;;  %vm401_vm4 = vcmp.lt.s32.totalorder %v399_v32, 512 }
  0xc8   :  { %v317_v47 = vadd.f32 0.5, %v313_v38  ;;  %v325_v48 = vmul.f32 %v323_v35, %v315_v39 }
  0xc9   :  { %v318_v49 = vadd.f32 0.5, %v314_v40  ;;  %v326_v42 = vmul.f32 %v323_v35, %v316_v41 }
  0xca   :  { %v327_v50 = vmul.f32 %v323_v35, %v317_v47  ;;  %v330_v59 = vsel %vm329_vm0, %v325_v48, 0.0 }
  0xcb   :  { %v328_v60 = vmul.f32 %v323_v35, %v318_v49  ;;  %v331_v61 = vrot.slane %v330_v59, 4  ;;  %v337_v55 = vsel %vm329_vm0, %v326_v42, 0.0 }
  0xcc   :  { %v338_v56 = vrot.slane %v337_v55, 4  ;;  %v344_v57 = vsel %vm329_vm0, %v327_v50, 0.0 }
  0xcd   :  { %v332_v58 = vadd.f32 %v331_v61, %v330_v59  ;;  %v345_v43 = vrot.slane %v344_v57, 4  ;;  %v351_v44 = vsel %vm329_vm0, %v328_v60, 0.0 }
  0xce   :  { %v339_v45 = vadd.f32 %v338_v56, %v337_v55  ;;  %v352_v46 = vrot.slane %v351_v44, 4 }
  0xcf   :  { %v333_v62 = vrot.slane %v332_v58, 2  ;;  %v346_v51 = vadd.f32 %v345_v43, %v344_v57 }
  0xd0   :  { %v340_v52 = vrot.slane %v339_v45, 2  ;;  %v353_v53 = vadd.f32 %v352_v46, %v351_v44 }
  0xd1   :  { %v334_v54 = vadd.f32 %v333_v62, %v332_v58  ;;  %v347_v63 = vrot.slane %v346_v51, 2 }
  0xd2   :  { %v341_v1 = vadd.f32 %v340_v52, %v339_v45  ;;  %v354_v2 = vrot.slane %v353_v53, 2 }
  0xd3   :  { %v335_v3 = vrot.slane %v334_v54, 1  ;;  %v348_v4 = vadd.f32 %v347_v63, %v346_v51 }
  0xd4   :  { %v342_v5 = vrot.slane %v341_v1, 1  ;;  %v355_v6 = vadd.f32 %v354_v2, %v353_v53 }
  0xd5   :  { %v336_v9 = vadd.f32 %v335_v3, %v334_v54  ;;  %v349_v10 = vrot.slane %v348_v4, 1 }
  0xd6   :  { %v343_v13 = vadd.f32 %v342_v5, %v341_v1  ;;  %v356_v14 = vrot.slane %v355_v6, 1 }
  0xd7   :  { %v350_v15 = vadd.f32 %v349_v10, %v348_v4  ;;  %v365_v17 = vadd.f32 %v364_v7, %v336_v9 }
  0xd8   :  { %v357_v18 = vadd.f32 %v356_v14, %v355_v6  ;;  %v366_v19 = vadd.f32 %v364_v7, %v343_v13 }
  0xd9   :  { %v367_v20 = vadd.f32 %v364_v7, %v350_v15  ;;  %v369_v21 = vmul.f32 0.5, %v365_v17 }
  0xda   :  { %v368_v22 = vadd.f32 %v364_v7, %v357_v18  ;;  %v370_v23 = vmul.f32 0.5, %v366_v19 }
  0xdb   :  { %v371_v24 = vmul.f32 0.5, %v367_v20  ;;  %465 = vtanh.f32 %v369_v21 }
  0xdc   :  { %v372_v26 = vmul.f32 0.5, %v368_v22  ;;  %467 = vtanh.f32 %v370_v23 }
  0xdd   :  { %469 = vtanh.f32 %v371_v24 }
  0xde   :  { %471 = vtanh.f32 %v372_v26 }
  0xe1   :  { %v466_v27 = vpop.eup %465 }
  0xe2   :  { %v468_v8 = vpop.eup %467  ;;  %v377_v11 = vmul.f32 0.5, %v466_v27 }
  0xe3   :  { %v470_v28 = vpop.eup %469  ;;  %v378_v25 = vmul.f32 0.5, %v468_v8 }
  0xe4   :  { %v472_v29 = vpop.eup %471  ;;  %v379_v30 = vmul.f32 0.5, %v470_v28  ;;  %v381_v33 = vadd.f32 0.5, %v377_v11 }
  0xe5   :  { %v380_v31 = vmul.f32 0.5, %v472_v29  ;;  %v382_v12 = vadd.f32 0.5, %v378_v25 }
  0xe6   :  { %v383_v16 = vadd.f32 0.5, %v379_v30 }
  0xe7   :  { %v384_v34 = vadd.f32 0.5, %v380_v31  ;;  %v389_v35 = vrot.slane %v382_v12, 7 }
  0xe8   :  { %v390_v36 = vrot.slane %v383_v16, 6 }
  0xe9   :  { %v391_v37 = vrot.slane %v384_v34, 5  ;;  %v393_v38 = vsel %vm392_vm1, %v381_v33, %v389_v35 }
  0xeb   :  { %v395_v39 = vsel %vm394_vm2, %v390_v36, %v391_v37 }
  0xec   :  { %v397_v40 = vsel %vm396_vm3, %v393_v38, %v395_v39 }
  0xed   :  { %403 = vst.msk [vmem:[#allocation6] sm:$0xf] %vm401_vm4, %v397_v40 }
  0xee   :  { %414 = dma.vmem_to_hbm [thread:$0]  %s410_s5, 64, %s412_s15, [#allocation5]  }
  0xef   :  { %523 = dma.done.wait [#allocation5], 64  }
  0xf0   :  { %524 = vsyncadd [#allocation5], 4294967232 }
  0xf1   :  { %419 = vsyncpa [#allocation4], 1 }
  0xf2   :  { %420 = vsyncpa [#allocation5], 1 }

</bundles_post_ra>
